<compile_context>
chip_gen: v6e
topology: v6e:2x2x1
jax: 0.10.0
libtpu: 0.0.40
codegen_flags: <defaults>
</compile_context>

<pallas_src>
import functools
import math

import jax
import jax.numpy as jnp
from jax import lax
from jax.experimental import pallas as pl
from jax.experimental.pallas import tpu as pltpu


def _round_up(x, m):
    return ((x + m - 1) // m) * m


def _pick_tile(dim, tile_max, align):
    """Tile <= max(tile_max, align), aligned to `align`, minimizing padding waste."""
    if dim <= tile_max:
        return _round_up(dim, align)
    n_tiles = math.ceil(dim / tile_max)
    return _round_up(math.ceil(dim / n_tiles), align)


def _student_rf_kernel_acc_out(x_ref, w_ref, o_ref, *, inv_sqrt_p):
    """f32-output path: accumulate directly into the k-resident output tile."""
    k = pl.program_id(2)

    @pl.when(k == 0)
    def _init():
        o_ref[...] = jnp.zeros_like(o_ref)

    # x tile (tm, tk) contracted against native-layout weight tile (tn, tk) on
    # their last dims -> (tm, tn).  No HBM-side transpose; XLU work is hidden
    # under the weight-streaming DMA.
    o_ref[...] += lax.dot_general(
        x_ref[...], w_ref[...],
        dimension_numbers=(((1,), (1,)), ((), ())),
        preferred_element_type=jnp.float32,
    )

    @pl.when(k == pl.num_programs(2) - 1)
    def _finalize():
        o_ref[...] = o_ref[...] * inv_sqrt_p


def _student_rf_kernel_scratch(x_ref, w_ref, o_ref, acc_ref, *, inv_sqrt_p):
    """Narrow-output path: f32 VMEM accumulator, scale + cast on the last k."""
    k = pl.program_id(2)

    @pl.when(k == 0)
    def _init():
        acc_ref[...] = jnp.zeros_like(acc_ref)

    acc_ref[...] += lax.dot_general(
        x_ref[...], w_ref[...],
        dimension_numbers=(((1,), (1,)), ((), ())),
        preferred_element_type=jnp.float32,
    )

    @pl.when(k == pl.num_programs(2) - 1)
    def _finalize():
        o_ref[...] = (acc_ref[...] * inv_sqrt_p).astype(o_ref.dtype)


def prepare_weight(w, compute_dtype=jnp.bfloat16):
    """Hoistable one-time weight preparation (cast only; no transpose needed).

    Call once and reuse the result across forward calls so the per-call path
    never re-reads the f32 weight from HBM just to cast it.
    """
    if compute_dtype is None or w.dtype == compute_dtype:
        return w
    return w.astype(compute_dtype)


def student_rf_forward(x, w, *, tm_max=512, tn_max=512, tk_max=512,
                       compute_dtype=jnp.bfloat16):
    """Student_RF forward: (x @ w.T) / sqrt(N).

    x: (B, N) projected datapoints; w: (K, N) nn.Linear weight (native layout).
    Returns (B, K) in x.dtype.  compute_dtype=None keeps exact f32 math.
    """
    B, N = x.shape
    K, Nw = w.shape
    assert N == Nw, "weight inner dim must match input feature dim"
    out_dtype = x.dtype
    inv_sqrt_p = 1.0 / math.sqrt(N)  # P = N (unpadded input dimension)

    # MXU input dtype (f32 accumulation preserves the reference math shape-wise).
    if compute_dtype is not None:
        if x.dtype != compute_dtype:
            x = x.astype(compute_dtype)
        if w.dtype != compute_dtype:
            w = w.astype(compute_dtype)   # no-op if prepare_weight() was used

    # Tile plan: minimize padding waste, keep sublane/lane alignment.
    tm = _pick_tile(B, tm_max, 16)     # 16 avoids half-packed bf16 sublanes
    tn = _pick_tile(K, tn_max, 128)    # lane-dense output tile
    tk = _pick_tile(N, tk_max, 128)    # reduction tile

    Bp = _round_up(B, tm)
    Kp = _round_up(K, tn)
    Np = _round_up(N, tk)

    # v7x megacore: make sure at least one 'parallel' axis has >= 2 tiles.
    if Bp // tm == 1 and Kp // tn == 1 and tn >= 256:
        tn_half = _round_up(tn // 2, 128)
        Kp_half = _round_up(K, tn_half)
        if Kp_half // tn_half >= 2:
            tn, Kp = tn_half, Kp_half

    if (Bp, Np) != (B, N):
        x = jnp.pad(x, ((0, Bp - B), (0, Np - N)))
    if (Kp, Np) != (K, Nw):
        w = jnp.pad(w, ((0, Kp - K), (0, Np - N)))

    grid = (Bp // tm, Kp // tn, Np // tk)

    in_bytes = x.size * x.dtype.itemsize + w.size * w.dtype.itemsize
    out_bytes = Bp * Kp * jnp.dtype(out_dtype).itemsize
    cost = pl.CostEstimate(
        flops=2 * Bp * Kp * Np,
        transcendentals=0,
        bytes_accessed=in_bytes + out_bytes,
    )

    in_specs = [
        pl.BlockSpec((tm, tk), lambda i, j, k: (i, k)),   # x tile
        pl.BlockSpec((tn, tk), lambda i, j, k: (j, k)),   # native (K, N) weight tile
    ]
    out_spec = pl.BlockSpec((tm, tn), lambda i, j, k: (i, j))
    cparams = pltpu.CompilerParams(
        dimension_semantics=("parallel", "parallel", "arbitrary"),
    )

    if jnp.dtype(out_dtype) == jnp.dtype(jnp.float32):
        # Accumulate directly into the resident f32 output tile (no scratch).
        kernel = functools.partial(_student_rf_kernel_acc_out,
                                   inv_sqrt_p=inv_sqrt_p)
        out_padded = pl.pallas_call(
            kernel,
            out_shape=jax.ShapeDtypeStruct((Bp, Kp), out_dtype),
            grid=grid,
            in_specs=in_specs,
            out_specs=out_spec,
            compiler_params=cparams,
            cost_estimate=cost,
        )(x, w)
    else:
        kernel = functools.partial(_student_rf_kernel_scratch,
                                   inv_sqrt_p=inv_sqrt_p)
        out_padded = pl.pallas_call(
            kernel,
            out_shape=jax.ShapeDtypeStruct((Bp, Kp), out_dtype),
            grid=grid,
            in_specs=in_specs,
            out_specs=out_spec,
            scratch_shapes=[pltpu.VMEM((tm, tn), jnp.float32)],
            compiler_params=cparams,
            cost_estimate=cost,
        )(x, w)

    if (Bp, Kp) != (B, K):
        out_padded = out_padded[:B, :K]
    return out_padded


if __name__ == "__main__":
    # Small shapes consistent with the module: N = input dim (self.P), K = hidden neurons.
    B = 16   # batch of projected datapoints
    N = 64   # input dimension (self.P)
    K = 32   # number of hidden neurons

    key = jax.random.PRNGKey(0)
    kx, kw = jax.random.split(key)

    x = jax.random.normal(kx, (B, N), dtype=jnp.float32)
    # nn.init.normal_(self.fc1.weight, std=0.01); bias=False
    w = 0.01 * jax.random.normal(kw, (K, N), dtype=jnp.float32)

    # Reference (plain JAX, f32) — same math as the PyTorch module.
    ref = (x @ w.T) / math.sqrt(N)

    # --- default bf16-MXU path: weight cast hoisted once, forward under one jit ---
    w_bf16 = prepare_weight(w, jnp.bfloat16)          # one-time, reused every call
    fwd_bf16 = jax.jit(student_rf_forward)            # cast/pad fuse into one pass
    out = jax.block_until_ready(fwd_bf16(x, w_bf16))
    assert out.shape == (B, K), out.shape
    assert jnp.allclose(out, ref, rtol=2e-2, atol=1e-3), float(
        jnp.max(jnp.abs(out - ref)))

    # --- exact f32 parity path (compute_dtype=None) ---
    fwd_f32 = jax.jit(functools.partial(student_rf_forward, compute_dtype=None))
    out_f32 = jax.block_until_ready(fwd_f32(x, w))
    assert out_f32.shape == (B, K), out_f32.shape
    assert jnp.allclose(out_f32, ref, rtol=1e-5, atol=1e-6), float(
        jnp.max(jnp.abs(out_f32 - ref)))

    print("KERNEL_OK")
</pallas_src>

<mosaic_0001>
module attributes {stable_mosaic.version = 11 : i64} {
  func.func @_student_rf_kernel_acc_out(%arg0: i32, %arg1: i32, %arg2: i32, %arg3: memref<16x128xbf16, #tpu.memory_space<vmem>>, %arg4: memref<128x128xbf16, #tpu.memory_space<vmem>>, %arg5: memref<16x128xf32, #tpu.memory_space<vmem>>) attributes {dimension_semantics = [#tpu.dimension_semantics<parallel>, #tpu.dimension_semantics<parallel>, #tpu.dimension_semantics<arbitrary>], iteration_bounds = array<i64: 1, 1, 1>, scalar_prefetch = 0 : i64, scratch_operands = 0 : i64, tpu.core_type = #tpu.core_type<tc>, window_params = [{transform_indices = @transform_0, window_bounds = array<i64: 16, 128>}, {transform_indices = @transform_1, window_bounds = array<i64: 128, 128>}, {transform_indices = @transform_2, window_bounds = array<i64: 16, 128>}]} {
    %c0_i32 = arith.constant 0 : i32
    %0 = arith.cmpi eq, %arg2, %c0_i32 : i32
    %1 = arith.extui %0 : i1 to i32
    %c0_i32_0 = arith.constant 0 : i32
    %2 = arith.cmpi ne, %1, %c0_i32_0 : i32
    scf.if %2 {
      %cst_10 = arith.constant 0.000000e+00 : f32
      %12 = vector.broadcast %cst_10 : f32 to vector<16x128xf32>
      %c0_11 = arith.constant 0 : index
      %c0_12 = arith.constant 0 : index
      %13 = vector.load %arg5[%c0_11, %c0_12] : memref<16x128xf32, #tpu.memory_space<vmem>>, vector<16x128xf32>
      tpu.vector_store %arg5[%c0_11, %c0_12], %12 {strides = array<i32>} : memref<16x128xf32, #tpu.memory_space<vmem>>, vector<16x128xf32>,
    } else {
    }
    %c0 = arith.constant 0 : index
    %c0_1 = arith.constant 0 : index
    %3 = vector.load %arg5[%c0, %c0_1] : memref<16x128xf32, #tpu.memory_space<vmem>>, vector<16x128xf32>
    %c0_2 = arith.constant 0 : index
    %c0_3 = arith.constant 0 : index
    %4 = vector.load %arg3[%c0_2, %c0_3] : memref<16x128xbf16, #tpu.memory_space<vmem>>, vector<16x128xbf16>
    %c0_4 = arith.constant 0 : index
    %c0_5 = arith.constant 0 : index
    %5 = vector.load %arg4[%c0_4, %c0_5] : memref<128x128xbf16, #tpu.memory_space<vmem>>, vector<128x128xbf16>
    %cst = arith.constant dense<0.000000e+00> : vector<16x128xf32>
    %6 = tpu.matmul %4, %5, %cst {dimension_numbers = #tpu.dot_dimension_numbers<[1], [1], [0], [0], [0, 0, 1, 0], [], []>} : vector<16x128xbf16>, vector<128x128xbf16>, vector<16x128xf32> -> vector<16x128xf32>
    %7 = arith.addf %3, %6 : vector<16x128xf32>
    %c0_6 = arith.constant 0 : index
    %c0_7 = arith.constant 0 : index
    %8 = vector.load %arg5[%c0_6, %c0_7] : memref<16x128xf32, #tpu.memory_space<vmem>>, vector<16x128xf32>
    tpu.vector_store %arg5[%c0_6, %c0_7], %7 {strides = array<i32>} : memref<16x128xf32, #tpu.memory_space<vmem>>, vector<16x128xf32>,
    %c0_i32_8 = arith.constant 0 : i32
    %9 = arith.cmpi eq, %arg2, %c0_i32_8 : i32
    %10 = arith.extui %9 : i1 to i32
    %c0_i32_9 = arith.constant 0 : i32
    %11 = arith.cmpi ne, %10, %c0_i32_9 : i32
    scf.if %11 {
      %c0_10 = arith.constant 0 : index
      %c0_11 = arith.constant 0 : index
      %12 = vector.load %arg5[%c0_10, %c0_11] : memref<16x128xf32, #tpu.memory_space<vmem>>, vector<16x128xf32>
      %cst_12 = arith.constant 1.250000e-01 : f32
      %13 = vector.broadcast %cst_12 : f32 to vector<16x128xf32>
      %14 = arith.mulf %12, %13 : vector<16x128xf32>
      %c0_13 = arith.constant 0 : index
      %c0_14 = arith.constant 0 : index
      %15 = vector.load %arg5[%c0_13, %c0_14] : memref<16x128xf32, #tpu.memory_space<vmem>>, vector<16x128xf32>
      tpu.vector_store %arg5[%c0_13, %c0_14], %14 {strides = array<i32>} : memref<16x128xf32, #tpu.memory_space<vmem>>, vector<16x128xf32>,
    } else {
    }
    return
  }
  func.func @transform_0(%arg0: i32, %arg1: i32, %arg2: i32) -> (i32, i32) {
    %c0_i32 = arith.constant 0 : i32
    return %arg0, %arg2 : i32, i32
  }
  func.func @transform_1(%arg0: i32, %arg1: i32, %arg2: i32) -> (i32, i32) {
    %c0_i32 = arith.constant 0 : i32
    return %arg1, %arg2 : i32, i32
  }
  func.func @transform_2(%arg0: i32, %arg1: i32, %arg2: i32) -> (i32, i32) {
    %c0_i32 = arith.constant 0 : i32
    return %arg0, %arg1 : i32, i32
  }
}

</mosaic_0001>

<bundles_post_ra>
// kernel: student_rf_forward.1
= control target key start
LH: loop header
LB: loop body
LE: loop exit
PB: predicated region body
PF: predicated region fallthrough
CT: control target
= control target key end

     0   :  { %v237_v1 = vmov 0.0   ;;  %vm238_vm0 = vmmov 0   ;;  %s287_s0 = inlined_call_operand.vmem [shape: bf16[16,128], index: 0, kind: input, shape index: {}]   ;;  %s288_s1 = inlined_call_operand.vmem [shape: bf16[128,128], index: 1, kind: input, shape index: {}]   ;;  %s289_s2 = inlined_call_operand.hbm [shape: f32[16,128], index: 2, kind: output, shape index: {}]  }
   0x1   :  { %v206_v0 = vld [vmem:[%s288_s1 + $0x38] sm:$0xff]   ;;  %181 = vmatprep.subr.bf16.mxu0 %v237_v1  ;;  %197 = vmatprep.mubr.msk.bf16.mxu0 %vm238_vm0, %v237_v1  ;;  %v207_v2 = vld [vmem:[%s288_s1 + $0x30] sm:$0xff]  }
   0x2   :  { %182 = vmatpush3.bf16.xpose.msra.mxu0 %v206_v0 }
   0x3   :  { %183 = vmatprep.subr.bf16.mxu0 %v237_v1 }
   0x4   :  { %7 = vsyncpa [#allocation3], 0  ;;  %v208_v3 = vld [vmem:[%s288_s1 + $0x28] sm:$0xff]   ;;  %v209_v4 = vld [vmem:[%s288_s1 + $0x20] sm:$0xff]   ;;  %s239_s27 = smov [#allocation2]  }
   0x5   :  { %v210_v5 = vld [vmem:[%s288_s1 + $0x18] sm:$0xff]   ;;  %v211_v6 = vld [vmem:[%s288_s1 + $0x10] sm:$0xff]   ;;  %v212_v7 = vld [vmem:[%s288_s1 + $0x8] sm:$0xff]   ;;  %s152_s28 = sshll.u32 %s239_s27, 4  ;;  %s153_s28 = int_to_ptr.vmem [resolvable:$true] %s152_s28 }
   0x6   :  { %v213_v8 = vld [vmem:[%s288_s1] sm:$0xff]   ;;  %s215_s29 = scalar_lea.vmem %s153_s28, 256  ;;  %p220_p1 = scmp.lt.s32.totalorder %s153_s28, %s153_s28 }
   0x7   :  { %v214_v9 = vld [vmem:[%s287_s0] sm:$0xff]   ;;  %p216_p0 = scmp.ne.s32.totalorder %s153_s28, %s215_s29  ;;  %p221_p2 = scmp.lt.s32.totalorder %s215_s29, %s215_s29 }
   0x9   :  { %p222_p3 = por %p221_p2, %p220_p1 }
   0xa   :  { %184 = vmatpush3.bf16.xpose.msra.mxu0 %v207_v2 }
   0xb   :  { %185 = vmatprep.subr.bf16.mxu0 %v237_v1  ;;  %p223_p4 = pnand %p222_p3, %p216_p0 }
  0x12   :  { %186 = vmatpush3.bf16.xpose.msra.mxu0 %v208_v3 }
  0x13   :  { %187 = vmatprep.subr.bf16.mxu0 %v237_v1 }
  0x1a   :  { %188 = vmatpush3.bf16.xpose.msra.mxu0 %v209_v4 }
  0x1b   :  { %189 = vmatprep.subr.bf16.mxu0 %v237_v1 }
  0x22   :  { %190 = vmatpush3.bf16.xpose.msra.mxu0 %v210_v5 }
  0x23   :  { %191 = vmatprep.subr.bf16.mxu0 %v237_v1 }
  0x2a   :  { %192 = vmatpush3.bf16.xpose.msra.mxu0 %v211_v6 }
  0x2b   :  { %193 = vmatprep.subr.bf16.mxu0 %v237_v1 }
  0x32   :  { %194 = vmatpush3.bf16.xpose.msra.mxu0 %v212_v7 }
  0x33   :  { %195 = vmatprep.subr.bf16.mxu0 %v237_v1 }
  0x3a   :  { %196 = vmatpush3.bf16.xpose.msra.mxu0 %v213_v8 }
  0x41   :  { %198 = vmatmul.mubr.bf16.vlgmr.msra.gmra.mxu0 %v214_v9 }
 0x101   :  { %v127_v10 = vpop.f32.mrf.mxu0 }
 0x102   :  { %v143_v12 = vmul.f32 0.125, %v127_v10 }
 0x103   :  { %v199_v11 = vpop.f32.mrf.mxu0 }
 0x104   :  { %145 = vst [vmem:[#allocation2] sm:$0xff] %v143_v12 }
 0x105   :  { %v130_v13 = vpop.f32.mrf.mxu0 }
 0x106   :  { %v144_v15 = vmul.f32 0.125, %v130_v13 }
 0x107   :  { %v200_v14 = vpop.f32.mrf.mxu0 }
 0x108   :  { %146 = vst [vmem:[#allocation2 + $0x8] sm:$0xff] %v144_v15 }
 0x109   :  { %226 = shalt.err (!%p223_p4)
}
 0x10a   :  { %s240_s0 = smov 128   ;;  %s241_s1 = smov 8  }
 0x10b   :  { %158 = dma.vmem_to_hbm [thread:$0]  %s153_s28, 256, %s289_s2, [#allocation3], %s240_s0, %s240_s0, %s241_s1  }
 0x10c   :  { %235 = dma.done.wait [#allocation3], 256  }
 0x10d   :  { %236 = vsyncadd [#allocation3], 4294967040 }
 0x10e   :  { %162 = vsyncpa [#allocation3], 1 }

</bundles_post_ra>
